<compile_context>
chip_gen: v6e
topology: v6e:2x2x1
jax: 0.10.0
libtpu: 0.0.40
codegen_flags: <defaults>
</compile_context>

<pallas_src>
import functools

import jax
import jax.numpy as jnp
from jax.experimental import pallas as pl
from jax.experimental.pallas import tpu as pltpu


def _outconv_kernel(w_ref, b_ref, x_ref, o_ref):
    """One (batch, row-tile) grid step.

    w_ref: (Cout, Cin)         in SMEM (scalar reads)
    b_ref: (Cout,)             in SMEM
    x_ref: (Cin,  TILE_R, 128) in VMEM (dense spatial slab per channel)
    o_ref: (Cout, TILE_R, 128) in VMEM
    """
    cin = x_ref.shape[0]
    cout = o_ref.shape[0]
    for co in range(cout):                                  # unrolled at trace time
        acc = x_ref[0].astype(jnp.float32) * w_ref[co, 0] + b_ref[co]
        for ci in range(1, cin):
            acc = acc + x_ref[ci].astype(jnp.float32) * w_ref[co, ci]
        o_ref[co] = acc.astype(o_ref.dtype)                 # dense (TILE_R,128) store


def _pick_tile_r(r, n, target_r):
    """Pick a row-tile: multiple of 8 (or full R), big, >=2 grid steps if N==1."""
    if r <= 8:
        return r                                            # full extent (allowed)
    t = min(target_r, (r // 8) * 8)
    t = max(t, 8)
    if n == 1:
        # Keep at least 2 row-tiles so both v7x TensorCores get work.
        half = max(8, (pl.cdiv(r, 2) // 8) * 8)
        t = min(t, half)
    return t


@functools.partial(jax.jit, static_argnames=("target_tile_r",))
def outconv_pallas(x_nchw, weight, bias, *, target_tile_r=2048):
    """1x1 Conv2d forward.

    x_nchw: (N, Cin, H, W)
    weight: (Cout, Cin)   -- nn.Conv2d weight (Cout, Cin, 1, 1) squeezed
    bias:   (Cout,)
    returns (N, Cout, H, W), same dtype as x.
    """
    n, cin, h, w = x_nchw.shape
    cout = weight.shape[0]
    hw = h * w

    # Minimal layout prep: only round H*W up to a multiple of 128 lanes
    # (no-op when it already is), then view as (N, Cin, R, 128).
    hw128 = pl.cdiv(hw, 128) * 128
    x_flat = x_nchw.reshape(n, cin, hw)
    if hw128 != hw:
        x_flat = jnp.pad(x_flat, ((0, 0), (0, 0), (0, hw128 - hw)))
    r = hw128 // 128
    x4 = x_flat.reshape(n, cin, r, 128)

    tile_r = _pick_tile_r(r, n, target_tile_r)
    grid = (n, pl.cdiv(r, tile_r))

    itemsize = jnp.dtype(x_nchw.dtype).itemsize
    in_block_bytes = cin * tile_r * 128 * itemsize
    out_block_bytes = cout * tile_r * 128 * itemsize
    # Double-buffered in+out blocks, plus headroom; keep under v7x physical VMEM.
    vmem_limit = int(min(max(2 * (in_block_bytes + out_block_bytes) * 5 // 4
                             + (1 << 20), 16 << 20), 48 << 20))

    cost = pl.CostEstimate(
        flops=2 * n * cin * cout * r * 128,
        transcendentals=0,
        bytes_accessed=(n * r * 128 * (cin + cout) * itemsize
                        + 4 * cout * (cin + 1)),
    )

    out4 = pl.pallas_call(
        _outconv_kernel,
        out_shape=jax.ShapeDtypeStruct((n, cout, r, 128), x_nchw.dtype),
        grid_spec=pltpu.PrefetchScalarGridSpec(
            num_scalar_prefetch=0,
            grid=grid,
            in_specs=[
                pl.BlockSpec(memory_space=pltpu.MemorySpace.SMEM),   # weight (resident)
                pl.BlockSpec(memory_space=pltpu.MemorySpace.SMEM),   # bias   (resident)
                pl.BlockSpec((None, cin, tile_r, 128),
                             lambda ni, ri: (ni, 0, ri, 0)),
            ],
            out_specs=pl.BlockSpec((None, cout, tile_r, 128),
                                   lambda ni, ri: (ni, 0, ri, 0)),
        ),
        compiler_params=pltpu.CompilerParams(
            dimension_semantics=("parallel", "parallel"),
            vmem_limit_bytes=vmem_limit,
        ),
        cost_estimate=cost,
    )(weight.astype(jnp.float32), bias.astype(jnp.float32), x4)

    out_flat = out4.reshape(n, cout, hw128)
    if hw128 != hw:
        out_flat = out_flat[:, :, :hw]
    return out_flat.reshape(n, cout, h, w)


def reference_outconv(x_nchw, weight, bias):
    # Plain-JAX reference of nn.Conv2d(kernel_size=1).
    out = jnp.einsum("nihw,oi->nohw", x_nchw, weight)
    return out + bias[None, :, None, None]


if __name__ == "__main__":
    # Small shapes consistent with the module: batch=2, in_channels=4,
    # out_channels=2, spatial=16x16.
    N, CIN, COUT, H, W = 2, 4, 2, 16, 16

    key = jax.random.PRNGKey(0)
    kx, kw, kb = jax.random.split(key, 3)

    x = jax.random.normal(kx, (N, CIN, H, W), dtype=jnp.float32)
    # Deterministic parameter init (mimics Conv2d's uniform(-1/sqrt(fan_in), +) scale).
    bound = 1.0 / jnp.sqrt(jnp.float32(CIN))
    weight = jax.random.uniform(kw, (COUT, CIN), dtype=jnp.float32,
                                minval=-bound, maxval=bound)
    bias = jax.random.uniform(kb, (COUT,), dtype=jnp.float32,
                              minval=-bound, maxval=bound)

    out = outconv_pallas(x, weight, bias)
    out = jax.block_until_ready(out)

    ref = reference_outconv(x, weight, bias)
    assert out.shape == (N, COUT, H, W)
    assert jnp.allclose(out, ref, atol=1e-5, rtol=1e-5), "mismatch vs reference"

    print("KERNEL_OK")
</pallas_src>

<mosaic_0001>
module attributes {stable_mosaic.version = 11 : i64} {
  func.func @_outconv_kernel(%arg0: i32, %arg1: i32, %arg2: memref<2x4xf32, #tpu.memory_space<smem>>, %arg3: memref<2xf32, #tpu.memory_space<smem>>, %arg4: memref<1x4x2x128xf32, #tpu.memory_space<vmem>>, %arg5: memref<1x2x2x128xf32, #tpu.memory_space<vmem>>) attributes {dimension_semantics = [#tpu.dimension_semantics<parallel>, #tpu.dimension_semantics<parallel>], iteration_bounds = array<i64: 2, 1>, scalar_prefetch = 0 : i64, scratch_operands = 0 : i64, tpu.core_type = #tpu.core_type<tc>, window_params = [{transform_indices = @transform_0, window_bounds = array<i64: 2, 4>}, {transform_indices = @transform_1, window_bounds = array<i64: 2>}, {transform_indices = @transform_2, window_bounds = array<i64: 1, 4, 2, 128>}, {transform_indices = @transform_3, window_bounds = array<i64: 1, 2, 2, 128>}]} {
    %c0 = arith.constant 0 : index
    %c0_0 = arith.constant 0 : index
    %c0_1 = arith.constant 0 : index
    %c0_2 = arith.constant 0 : index
    %0 = vector.load %arg4[%c0, %c0_0, %c0_1, %c0_2] : memref<1x4x2x128xf32, #tpu.memory_space<vmem>>, vector<1x1x2x128xf32>
    %1 = vector.shape_cast %0 : vector<1x1x2x128xf32> to vector<2x128xf32>
    %c0_3 = arith.constant 0 : index
    %c0_4 = arith.constant 0 : index
    %2 = memref.load %arg2[%c0_3, %c0_4] : memref<2x4xf32, #tpu.memory_space<smem>>
    %3 = vector.broadcast %2 : f32 to vector<2x128xf32>
    %4 = arith.mulf %1, %3 : vector<2x128xf32>
    %c0_5 = arith.constant 0 : index
    %5 = memref.load %arg3[%c0_5] : memref<2xf32, #tpu.memory_space<smem>>
    %6 = vector.broadcast %5 : f32 to vector<2x128xf32>
    %7 = arith.addf %4, %6 : vector<2x128xf32>
    %c0_6 = arith.constant 0 : index
    %c1 = arith.constant 1 : index
    %c0_7 = arith.constant 0 : index
    %c0_8 = arith.constant 0 : index
    %8 = vector.load %arg4[%c0_6, %c1, %c0_7, %c0_8] : memref<1x4x2x128xf32, #tpu.memory_space<vmem>>, vector<1x1x2x128xf32>
    %9 = vector.shape_cast %8 : vector<1x1x2x128xf32> to vector<2x128xf32>
    %c0_9 = arith.constant 0 : index
    %c1_10 = arith.constant 1 : index
    %10 = memref.load %arg2[%c0_9, %c1_10] : memref<2x4xf32, #tpu.memory_space<smem>>
    %11 = vector.broadcast %10 : f32 to vector<2x128xf32>
    %12 = arith.mulf %9, %11 : vector<2x128xf32>
    %13 = arith.addf %7, %12 : vector<2x128xf32>
    %c0_11 = arith.constant 0 : index
    %c2 = arith.constant 2 : index
    %c0_12 = arith.constant 0 : index
    %c0_13 = arith.constant 0 : index
    %14 = vector.load %arg4[%c0_11, %c2, %c0_12, %c0_13] : memref<1x4x2x128xf32, #tpu.memory_space<vmem>>, vector<1x1x2x128xf32>
    %15 = vector.shape_cast %14 : vector<1x1x2x128xf32> to vector<2x128xf32>
    %c0_14 = arith.constant 0 : index
    %c2_15 = arith.constant 2 : index
    %16 = memref.load %arg2[%c0_14, %c2_15] : memref<2x4xf32, #tpu.memory_space<smem>>
    %17 = vector.broadcast %16 : f32 to vector<2x128xf32>
    %18 = arith.mulf %15, %17 : vector<2x128xf32>
    %19 = arith.addf %13, %18 : vector<2x128xf32>
    %c0_16 = arith.constant 0 : index
    %c3 = arith.constant 3 : index
    %c0_17 = arith.constant 0 : index
    %c0_18 = arith.constant 0 : index
    %20 = vector.load %arg4[%c0_16, %c3, %c0_17, %c0_18] : memref<1x4x2x128xf32, #tpu.memory_space<vmem>>, vector<1x1x2x128xf32>
    %21 = vector.shape_cast %20 : vector<1x1x2x128xf32> to vector<2x128xf32>
    %c0_19 = arith.constant 0 : index
    %c3_20 = arith.constant 3 : index
    %22 = memref.load %arg2[%c0_19, %c3_20] : memref<2x4xf32, #tpu.memory_space<smem>>
    %23 = vector.broadcast %22 : f32 to vector<2x128xf32>
    %24 = arith.mulf %21, %23 : vector<2x128xf32>
    %25 = arith.addf %19, %24 : vector<2x128xf32>
    %c0_21 = arith.constant 0 : index
    %c0_22 = arith.constant 0 : index
    %c0_23 = arith.constant 0 : index
    %c0_24 = arith.constant 0 : index
    %26 = vector.load %arg5[%c0_21, %c0_22, %c0_23, %c0_24] : memref<1x2x2x128xf32, #tpu.memory_space<vmem>>, vector<1x1x2x128xf32>
    %27 = vector.shape_cast %26 : vector<1x1x2x128xf32> to vector<2x128xf32>
    %28 = vector.shape_cast %25 : vector<2x128xf32> to vector<1x1x2x128xf32>
    tpu.vector_store %arg5[%c0_21, %c0_22, %c0_23, %c0_24], %28 {strides = array<i32>} : memref<1x2x2x128xf32, #tpu.memory_space<vmem>>, vector<1x1x2x128xf32>,
    %c0_25 = arith.constant 0 : index
    %c0_26 = arith.constant 0 : index
    %c0_27 = arith.constant 0 : index
    %c0_28 = arith.constant 0 : index
    %29 = vector.load %arg4[%c0_25, %c0_26, %c0_27, %c0_28] : memref<1x4x2x128xf32, #tpu.memory_space<vmem>>, vector<1x1x2x128xf32>
    %30 = vector.shape_cast %29 : vector<1x1x2x128xf32> to vector<2x128xf32>
    %c1_29 = arith.constant 1 : index
    %c0_30 = arith.constant 0 : index
    %31 = memref.load %arg2[%c1_29, %c0_30] : memref<2x4xf32, #tpu.memory_space<smem>>
    %32 = vector.broadcast %31 : f32 to vector<2x128xf32>
    %33 = arith.mulf %30, %32 : vector<2x128xf32>
    %c1_31 = arith.constant 1 : index
    %34 = memref.load %arg3[%c1_31] : memref<2xf32, #tpu.memory_space<smem>>
    %35 = vector.broadcast %34 : f32 to vector<2x128xf32>
    %36 = arith.addf %33, %35 : vector<2x128xf32>
    %c0_32 = arith.constant 0 : index
    %c1_33 = arith.constant 1 : index
    %c0_34 = arith.constant 0 : index
    %c0_35 = arith.constant 0 : index
    %37 = vector.load %arg4[%c0_32, %c1_33, %c0_34, %c0_35] : memref<1x4x2x128xf32, #tpu.memory_space<vmem>>, vector<1x1x2x128xf32>
    %38 = vector.shape_cast %37 : vector<1x1x2x128xf32> to vector<2x128xf32>
    %c1_36 = arith.constant 1 : index
    %c1_37 = arith.constant 1 : index
    %39 = memref.load %arg2[%c1_36, %c1_37] : memref<2x4xf32, #tpu.memory_space<smem>>
    %40 = vector.broadcast %39 : f32 to vector<2x128xf32>
    %41 = arith.mulf %38, %40 : vector<2x128xf32>
    %42 = arith.addf %36, %41 : vector<2x128xf32>
    %c0_38 = arith.constant 0 : index
    %c2_39 = arith.constant 2 : index
    %c0_40 = arith.constant 0 : index
    %c0_41 = arith.constant 0 : index
    %43 = vector.load %arg4[%c0_38, %c2_39, %c0_40, %c0_41] : memref<1x4x2x128xf32, #tpu.memory_space<vmem>>, vector<1x1x2x128xf32>
    %44 = vector.shape_cast %43 : vector<1x1x2x128xf32> to vector<2x128xf32>
    %c1_42 = arith.constant 1 : index
    %c2_43 = arith.constant 2 : index
    %45 = memref.load %arg2[%c1_42, %c2_43] : memref<2x4xf32, #tpu.memory_space<smem>>
    %46 = vector.broadcast %45 : f32 to vector<2x128xf32>
    %47 = arith.mulf %44, %46 : vector<2x128xf32>
    %48 = arith.addf %42, %47 : vector<2x128xf32>
    %c0_44 = arith.constant 0 : index
    %c3_45 = arith.constant 3 : index
    %c0_46 = arith.constant 0 : index
    %c0_47 = arith.constant 0 : index
    %49 = vector.load %arg4[%c0_44, %c3_45, %c0_46, %c0_47] : memref<1x4x2x128xf32, #tpu.memory_space<vmem>>, vector<1x1x2x128xf32>
    %50 = vector.shape_cast %49 : vector<1x1x2x128xf32> to vector<2x128xf32>
    %c1_48 = arith.constant 1 : index
    %c3_49 = arith.constant 3 : index
    %51 = memref.load %arg2[%c1_48, %c3_49] : memref<2x4xf32, #tpu.memory_space<smem>>
    %52 = vector.broadcast %51 : f32 to vector<2x128xf32>
    %53 = arith.mulf %50, %52 : vector<2x128xf32>
    %54 = arith.addf %48, %53 : vector<2x128xf32>
    %c0_50 = arith.constant 0 : index
    %c1_51 = arith.constant 1 : index
    %c0_52 = arith.constant 0 : index
    %c0_53 = arith.constant 0 : index
    %55 = vector.load %arg5[%c0_50, %c1_51, %c0_52, %c0_53] : memref<1x2x2x128xf32, #tpu.memory_space<vmem>>, vector<1x1x2x128xf32>
    %56 = vector.shape_cast %55 : vector<1x1x2x128xf32> to vector<2x128xf32>
    %57 = vector.shape_cast %54 : vector<2x128xf32> to vector<1x1x2x128xf32>
    tpu.vector_store %arg5[%c0_50, %c1_51, %c0_52, %c0_53], %57 {strides = array<i32>} : memref<1x2x2x128xf32, #tpu.memory_space<vmem>>, vector<1x1x2x128xf32>,
    return
  }
  func.func @transform_0(%arg0: i32, %arg1: i32) -> (i32, i32) {
    %c0_i32 = arith.constant 0 : i32
    %c0_i32_0 = arith.constant 0 : i32
    %c0_i32_1 = arith.constant 0 : i32
    return %c0_i32, %c0_i32_0 : i32, i32
  }
  func.func @transform_1(%arg0: i32, %arg1: i32) -> i32 {
    %c0_i32 = arith.constant 0 : i32
    %c0_i32_0 = arith.constant 0 : i32
    return %c0_i32 : i32
  }
  func.func @transform_2(%arg0: i32, %arg1: i32) -> (i32, i32, i32, i32) {
    %c0_i32 = arith.constant 0 : i32
    %c0_i32_0 = arith.constant 0 : i32
    %c0_i32_1 = arith.constant 0 : i32
    return %arg0, %c0_i32, %arg1, %c0_i32_0 : i32, i32, i32, i32
  }
  func.func @transform_3(%arg0: i32, %arg1: i32) -> (i32, i32, i32, i32) {
    %c0_i32 = arith.constant 0 : i32
    %c0_i32_0 = arith.constant 0 : i32
    %c0_i32_1 = arith.constant 0 : i32
    return %arg0, %c0_i32, %arg1, %c0_i32_0 : i32, i32, i32, i32
  }
}

</mosaic_0001>

<bundles_post_ra>
// kernel: outconv_pallas.1
= control target key start
LH: loop header
LB: loop body
LE: loop exit
PB: predicated region body
PF: predicated region fallthrough
CT: control target
= control target key end

     0   :  { %8 = vsyncpa [#allocation3], 0  ;;  %s636_s0 = inlined_call_operand.vmem [shape: f32[2,4], index: 0, kind: input, shape index: {}]   ;;  %s637_s1 = inlined_call_operand.vmem [shape: f32[2], index: 1, kind: input, shape index: {}]   ;;  %s638_s2 = inlined_call_operand.vmem [shape: f32[2,4,2,128], index: 2, kind: input, shape index: {}]   ;;  %s639_s3 = inlined_call_operand.vmem [shape: f32[2,2,2,128], index: 3, kind: output, shape index: {}]  }
   0x1   :  { %9 = vsyncpa [#allocation5], 0  ;;  %s546_s12 = smov 0   ;;  %s548_s13 = smov 0  }
   0x2   :  { %s550_s14 = smov 0  }
   0x3 LB: > { %s385_s15 = sadd.s32 4294967295, %s522_s14   ;;  %s27_s16 = sadd.s32 1, %s518_s13  ;;  %s522_s14 = sphi %s550_s14, %s15_s14   ;;  %s518_s13 = sphi %s548_s13, %s649_s13   ;;  %s514_s12 = sphi %s546_s12, %s648_s12  }
   0x4   : > { %p29_p0 = scmp.ge.s32.totalorder %s27_s16, 2  ;;  %p387_p1 = scmp.ge.s32.totalorder %s522_s14, 1 }
   0x5   : > { %p130_p2 = scmp.lt.s32.totalorder %s522_s14, 3  ;;  %p571_p4 = scmp.eq.s32.totalorder %s385_s15, 0 }
   0x6   : > { %s651_s16 = smov (%p29_p0, %s27_s16), 0  ;;  %s143_s21 = sshll.u32 %s636_s0, 4  ;;  %s144_s21 = int_to_ptr.vmem [resolvable:$true] %s143_s21 }
   0x7   : > { %p567_p3 = pnand %p387_p1, %p130_p2  ;;  %s154_s24 = sshll.u32 %s637_s1, 4  ;;  %s155_s24 = int_to_ptr.vmem [resolvable:$true] %s154_s24 }
   0x8   : > { %s644_s18 = scalar_select %p571_p4, 1, 0 }
   0x9   : > { %s643_s17 = scalar_select %p567_p3, 1, 0 }
   0xa   : > { %p425_p5 = pneg %p567_p3  ;;  %s462_s26 = scalar_lea.vmem %s144_s21, 32 }
   0xb   : > { %p463_p7 = scmp.ne.s32.totalorder %s144_s21, %s462_s26  ;;  %p470_p11 = scmp.lt.s32.totalorder %s144_s21, %s144_s21 }
   0xc   : > { %p585_p6 = pnand %p571_p4, %p425_p5  ;;  %p471_p12 = scmp.lt.s32.totalorder %s462_s26, %s462_s26 }
   0xe   : > { %p464_p8 = pneg %p585_p6  ;;  %p472_p13 = por %p471_p12, %p470_p11 }
  0x10   : > { %p465_p9 = pnand %p464_p8, %p463_p7 }
  0x12   : > { %p466_p10 = pneg %p465_p9 }
  0x14   : > { %p473_p0 = pnand %p472_p13, %p466_p10 }
  0x16   : > { %476 = shalt.err (!%p473_p0)
}
  0x17   : > { %s524_s27 = smov [#allocation2]   ;;  %s477_s28 = scalar_lea.vmem %s155_s24, 16 }
  0x18   : > { %428 = dma.vmem_to_smem (!%p585_p6), %s144_s21, 32, %s524_s27, [#allocation3]  }
  0x19   : > { %p478_p1 = scmp.ne.s32.totalorder %s155_s24, %s477_s28  ;;  %p485_p4 = scmp.lt.s32.totalorder %s155_s24, %s155_s24 }
  0x1a   : > { %p486_p3 = scmp.lt.s32.totalorder %s477_s28, %s477_s28 }
  0x1b   : > { %p480_p2 = pnand %p478_p1, %p464_p8 }
  0x1c   : > { %p487_p7 = por %p486_p3, %p485_p4 }
  0x1d   : > { %p481_p5 = pneg %p480_p2 }
  0x1f   : > { %p488_p9 = pnand %p487_p7, %p481_p5 }
  0x21   : > { %491 = shalt.err (!%p488_p9)
}
  0x22   : > { %s525_s29 = smov [#allocation4]   ;;  %p646_p10 = scmp.ne.s32.totalorder %s643_s17, 0 }
  0x23   : > { %431 = dma.vmem_to_smem (!%p585_p6), %s155_s24, 16, %s525_s29, [#allocation5]  }
  0x24   : > { %178 = sbr.rel (%p646_p10) target bundleno = 69 (0x45), region = 32  ;;  %p647_p11 = scmp.ne.s32.totalorder (!%p646_p10), %s644_s18, 0 }
  0x29   : > { %505 = dma.done.wait (%p647_p11), [#allocation3], 32  }
  0x2a   : > { %507 = vsyncadd (%p647_p11), [#allocation3], 4294967264 }
  0x2b   : > { %509 = dma.done.wait (%p647_p11), [#allocation5], 16  }
  0x2c   : > { %511 = vsyncadd (%p647_p11), [#allocation5], 4294967280 }
  0x2d   : > { %188 = sfence }
  0x2e   : > { %p213_p3 = scmp.lt.s32.totalorder %s514_s12, 1  ;;  %s230_s30 = sld [smem:[#allocation2]] }
  0x2f   : > { %s233_s4 = sld [smem:[#allocation4]] }
  0x30   : > { %s653_s12 = smov (!%p213_p3, %s514_s12), 1  ;;  %s399_s5 = sld [smem:[#allocation2 + $0x1]] }
  0x31   : > { %s415_s6 = sshll.u32 %s653_s12, 3  ;;  %s401_s10 = sld [smem:[#allocation2 + $0x2]] }
  0x32   : > { %s613_s9 = scalar_lea.vmem %s638_s2, %s415_s6  ;;  %s403_s11 = sld [smem:[#allocation2 + $0x3]] }
  0x33   : > { %v229_v0 = vld [vmem:[%s613_s9] sm:$0x3]  ;;  %v398_v4 = vld [vmem:[%s613_s9 + $0x2] sm:$0x3]  ;;  %s404_s15 = sld [smem:[#allocation2 + $0x80]]  ;;  %s416_s21 = sshll.u32 %s653_s12, 2 }
  0x34   : > { %v231_v1 = vstv %s230_s30  ;;  %s405_s17 = sld [smem:[#allocation4 + $0x1]]  ;;  %v400_v8 = vld [vmem:[%s613_s9 + $0x4] sm:$0x3]  ;;  %v402_v10 = vld [vmem:[%s613_s9 + $0x6] sm:$0x3]  ;;  %s228_s24 = scalar_lea.vmem %s639_s3, %s416_s21 }
  0x35   : > { %v232_v2 = vmul.f32 %v231_v1, %v229_v0  ;;  %v234_v3 = vstv %s233_s4  ;;  %s407_s18 = sld [smem:[#allocation2 + $0x81]]  ;;  %v255_v12 = vld [vmem:[%s613_s9] sm:$0x3]  ;;  %v406_v17 = vld [vmem:[%s613_s9 + $0x2] sm:$0x3] }
  0x36   : > { %v239_v6 = vstv %s399_s5  ;;  %s409_s19 = sld [smem:[#allocation2 + $0x82]]  ;;  %v408_v21 = vld [vmem:[%s613_s9 + $0x4] sm:$0x3]  ;;  %v410_v23 = vld [vmem:[%s613_s9 + $0x6] sm:$0x3] }
  0x37   : > { %v235_v5 = vadd.f32 %v234_v3, %v232_v2  ;;  %v240_v7 = vmul.f32 %v398_v4, %v239_v6  ;;  %v245_v11 = vstv %s401_s10  ;;  %s411_s20 = sld [smem:[#allocation2 + $0x83]] }
  0x38   : > { %v246_v13 = vmul.f32 %v400_v8, %v245_v11  ;;  %v251_v14 = vstv %s403_s11 }
  0x39   : > { %v241_v9 = vadd.f32 %v240_v7, %v235_v5  ;;  %v252_v15 = vmul.f32 %v402_v10, %v251_v14  ;;  %v257_v16 = vstv %s404_s15 }
  0x3a   : > { %v258_v19 = vmul.f32 %v257_v16, %v255_v12  ;;  %v260_v20 = vstv %s405_s17 }
  0x3b   : > { %v247_v18 = vadd.f32 %v246_v13, %v241_v9  ;;  %v264_v22 = vstv %s407_s18 }
  0x3c   : > { %v261_v25 = vadd.f32 %v260_v20, %v258_v19  ;;  %v265_v26 = vmul.f32 %v406_v17, %v264_v22  ;;  %v269_v27 = vstv %s409_s19 }
  0x3d   : > { %v253_v24 = vadd.f32 %v252_v15, %v247_v18  ;;  %v270_v28 = vmul.f32 %v408_v21, %v269_v27  ;;  %v274_v29 = vstv %s411_s20 }
  0x3e   : > { %v266_v30 = vadd.f32 %v265_v26, %v261_v25  ;;  %v275_v31 = vmul.f32 %v410_v23, %v274_v29 }
  0x3f   : > { %254 = vst [vmem:[%s228_s24] sm:$0x3] %v253_v24 }
  0x40   : > { %v271_v32 = vadd.f32 %v270_v28, %v266_v30 }
  0x42   : > { %v276_v33 = vadd.f32 %v275_v31, %v271_v32 }
  0x44   : > { %412 = vst [vmem:[%s228_s24 + $0x2] sm:$0x3] %v276_v33 }
  0x45 PF: > { %s15_s14 = sadd.s32 1, %s522_s14   ;;  %s648_s12 = smov %s518_s13 }
  0x46   : > { %p12_p4 = scmp.ge.s32.totalorder %s15_s14, 4   ;;  %s649_s13 = smov %s651_s16 }
  0x48   :  { %14 = sbr.rel (!%p12_p4) target bundleno = 3 (0x3), region = 75 }
  0x4d   :  { %306 = vsyncpa [#allocation3], 1 }
  0x4e   :  { %308 = vsyncpa [#allocation3 + $0x1], 1 }
  0x4f   :  { %309 = vsyncpa [#allocation5], 1 }

</bundles_post_ra>
